<compile_context>
chip_gen: v7x
topology: tpu7x:2x2x1
jax: 0.10.0
libtpu: 0.0.40
codegen_flags: <defaults>
</compile_context>

<pallas_src>
import numpy as np
import jax
import jax.numpy as jnp
from jax import lax
from jax.experimental import pallas as pl
from jax.experimental.pallas import tpu as pltpu


def _round_up(a: int, m: int) -> int:
    return (a + m - 1) // m * m


def _make_kernel(inv_gnorm: float, nb: int, L: int, F: int, n: int, matmul_dtype):
    def kernel(x_ref, cwt_ref, cb_ref, w_ref, b_ref, out_ref, wts_ref):
        # x_ref:   (NB, L, F)   f32   one block of batch elements
        # cwt_ref: (F, n)       f32   conv1d 1x1 weight, pre-transposed
        # cb_ref:  (1, n)       f32   conv1d bias
        # w_ref:   (n, 1)       f32   per-head scale
        # b_ref:   (n, 1)       f32   per-head shift
        # out_ref: (NB, n*F)          lane-dense concat-over-heads output
        # wts_ref: (NB, n*L)          lane-dense flattened softmax weights
        x = x_ref[...]                                               # (NB, L, F) f32

        # --- scores: 1x1 conv == one matmul on the flattened (NB*L, F) slab.
        # Kept in f32 so the exported softmax weights are not bf16-limited; the MXU
        # has enormous slack in this HBM-bound regime so this costs ~nothing.
        # NOTE: the reshape collapses leading dims; it is a zero-copy relayout only
        # when L % 8 == 0 (true for the shapes used here, L == 8).
        x2d = x.reshape(nb * L, F)
        s2d = jnp.dot(x2d, cwt_ref[...], preferred_element_type=jnp.float32)
        scores = s2d.reshape(nb, L, n) + cb_ref[...][None]           # (NB, L, n)

        # --- softmax over L (axis=1); VPU divides replaced by one EUP reciprocal
        # per (row, head) plus cheap multiplies.
        m = jnp.max(scores, axis=1, keepdims=True)
        e = jnp.exp(scores - m)
        denom = jnp.sum(e, axis=1, keepdims=True)                    # (NB, 1, n)
        weights = e * pl.reciprocal(denom, approx=True)              # (NB, L, n)

        # (NB, n, L) layout is required for the exported weights anyway; reuse the
        # same transposed slab for the pooling matmul (canonical 'bnl,blf->bnf').
        weights_t = jnp.transpose(weights, (0, 2, 1))                # (NB, n, L)
        # Lane-dense weights store: (NB, n*L) slab instead of last-dim-8 masked vst.
        wts_ref[...] = weights_t.astype(wts_ref.dtype).reshape(nb, n * L)

        # Single bf16 cast of x (scores matmul above stayed f32, so no duplicate cast).
        xb = x.astype(matmul_dtype)
        pooled = lax.dot_general(
            weights_t.astype(matmul_dtype), xb,
            dimension_numbers=(((2,), (1,)), ((0,), (0,))),
            preferred_element_type=jnp.float32)                      # (NB, n, F)

        # --- per-head affine, then L2-normalize with rsqrt (EUP), 1/gnorm folded in.
        # No epsilon, matching the PyTorch reference; padded batch rows may produce
        # non-finite values but are sliced off in the wrapper.
        o = pooled * w_ref[...][None] + b_ref[...][None]             # (NB, n, F)
        inv = lax.rsqrt(jnp.sum(o * o, axis=-1, keepdims=True))
        o = o * (inv * inv_gnorm)

        # Lane-dense main output: (NB, n*F) slab (n*F == 128 here -> unmasked vst).
        out_ref[...] = o.reshape(nb, n * F).astype(out_ref.dtype)

    return kernel


def shifting_attention(x, conv_w, conv_b, w, b, *, nb=1024,
                       matmul_dtype=jnp.bfloat16, weights_dtype=jnp.float32):
    """x: (N, L, F) f32. Returns (outputs (N, n*F) f32, weights (N, n, L))."""
    N, L, F = x.shape
    n = conv_w.shape[0]
    inv_gnorm = float(1.0 / np.sqrt(n))

    # --- Block-size selection for an HBM-bound kernel: biggest batch block that
    # fits a conservative VMEM budget (v7x has 64 MiB physical; v5e/v6e 128 MiB).
    # Estimate lane-padded VMEM bytes per batch row: double-buffered x / outputs
    # plus the slab-sized temporaries (scores, exp, weights, weights_t, bf16 x,
    # pooled) the kernel materializes.
    lanes = 128
    Lp = _round_up(L, 8)
    Fp = _round_up(F, lanes)
    n_lanes = _round_up(n, lanes)
    wts_itemsize = jnp.dtype(weights_dtype).itemsize
    bytes_per_row = (
        2 * Lp * Fp * 4                              # x block (double-buffered, f32)
        + 2 * _round_up(n * F, lanes) * 4            # main output block (x2 buffers)
        + 2 * _round_up(n * L, lanes) * wts_itemsize # weights output block (x2 buffers)
        + Lp * Fp * 2                                # one bf16 copy of x
        + 4 * Lp * n_lanes * 4                       # scores / exp / weights / weights_t
        + _round_up(n, 8) * Fp * 4                   # pooled
    )
    vmem_budget = 48 * 1024 * 1024                   # safe on all of v5e / v6e / v7x
    nb_cap = max(8, (vmem_budget // bytes_per_row) // 8 * 8)
    nb_cap = min(nb_cap, _round_up(nb, 8))

    if _round_up(N, 8) <= nb_cap:
        if N > 16:
            # Whole batch fits in one block: split into two grid steps so v7x's two
            # TensorCores both get work (no measurable cost on 1-TC v5e/v6e).
            NB = _round_up((N + 1) // 2, 8)
        else:
            NB = _round_up(N, 8)
    else:
        NB = nb_cap
    N_pad = _round_up(N, NB)
    if N_pad != N:
        x = jnp.pad(x, ((0, N_pad - N), (0, 0), (0, 0)))

    # Scoped-VMEM limit: never smaller than what we need (32 MiB floor keeps the
    # default from binding), capped at 64 MiB so it stays within v7x physical VMEM.
    vmem_need = bytes_per_row * NB + (2 << 20)
    vmem_limit = int(min(64 << 20, max(32 << 20, int(1.5 * vmem_need))))

    # Hoist parameter layout transforms out of the kernel (done once, tiny arrays).
    cw_t = jnp.asarray(conv_w, dtype=jnp.float32).T            # (F, n), f32 scores path
    cb2 = jnp.asarray(conv_b, dtype=jnp.float32).reshape(1, n)  # (1, n)
    w2 = jnp.asarray(w, dtype=jnp.float32).reshape(n, 1)        # (n, 1)
    b2 = jnp.asarray(b, dtype=jnp.float32).reshape(n, 1)        # (n, 1)

    grid = (N_pad // NB,)

    # Advisory cost hint for XLA scheduling around the custom call.
    flops = 4 * N_pad * L * F * n                    # two matmuls, 2*MAC each
    transcendentals = N_pad * n * (L + 2)            # exp + reciprocal + rsqrt
    bytes_accessed = int(
        N_pad * L * F * 4                            # x read
        + N_pad * n * F * 4                          # main output
        + N_pad * n * L * wts_itemsize               # weights output
        + (cw_t.size + cb2.size + w2.size + b2.size) * 4)

    out2d, wts2d = pl.pallas_call(
        _make_kernel(inv_gnorm, NB, L, F, n, matmul_dtype),
        out_shape=(
            jax.ShapeDtypeStruct((N_pad, n * F), jnp.float32),
            jax.ShapeDtypeStruct((N_pad, n * L), weights_dtype),
        ),
        grid_spec=pltpu.PrefetchScalarGridSpec(
            num_scalar_prefetch=0,
            grid=grid,
            in_specs=[
                pl.BlockSpec((NB, L, F), lambda i: (i, 0, 0)),   # x block
                pl.BlockSpec((F, n), lambda i: (0, 0)),          # conv weight (F, n)
                pl.BlockSpec((1, n), lambda i: (0, 0)),          # conv bias
                pl.BlockSpec((n, 1), lambda i: (0, 0)),          # per-head scale
                pl.BlockSpec((n, 1), lambda i: (0, 0)),          # per-head shift
            ],
            out_specs=[
                pl.BlockSpec((NB, n * F), lambda i: (i, 0)),     # lane-dense outputs
                pl.BlockSpec((NB, n * L), lambda i: (i, 0)),     # lane-dense weights
            ],
        ),
        compiler_params=pltpu.CompilerParams(
            dimension_semantics=("parallel",),
            vmem_limit_bytes=vmem_limit,
        ),
        cost_estimate=pl.CostEstimate(
            flops=flops,
            transcendentals=transcendentals,
            bytes_accessed=bytes_accessed,
        ),
    )(x, cw_t, cb2, w2, b2)

    # Contiguous reshape back to (N_pad, n, L) is free (metadata only), then slice.
    weights_out = wts2d.reshape(N_pad, n, L)[:N]
    return out2d[:N], weights_out


def _ref_forward(x, conv_w, conv_b, w, b):
    """Pure-JAX f32 reference of the PyTorch forward (for verification)."""
    n = conv_w.shape[0]
    gnorm = np.sqrt(n)
    scores = jnp.einsum("nlf,cf->ncl", x, conv_w) + conv_b[None, :, None]
    weights = jax.nn.softmax(scores, axis=-1)
    o = jnp.einsum("ncl,nlf->ncf", weights, x)
    o = o * w[None, :, None] + b[None, :, None]
    norm2 = jnp.sqrt(jnp.sum(o * o, axis=-1, keepdims=True))
    o = o / norm2 / gnorm
    outputs = o.reshape(x.shape[0], -1)
    return outputs, weights


def _glorot_normal(key, shape):
    # matches the module's glorot_normal for 1-D shapes:
    # fan_in = fan_out = sqrt(prod(shape)); std = sqrt(2/(fan_in+fan_out))
    if len(shape) == 2:
        fan_in, fan_out = shape
    else:
        fan_in = fan_out = np.sqrt(np.prod(shape))
    s = np.sqrt(2.0 / (fan_in + fan_out))
    return s * jax.random.normal(key, shape, dtype=jnp.float32)


if __name__ == "__main__":
    # Small shapes consistent with the forward: x = (N, L, F), n attention heads.
    N, L, F = 2, 8, 32
    n_att = 4

    key = jax.random.PRNGKey(0)
    kx, kcw, kcb, kw, kb = jax.random.split(key, 5)

    x = jax.random.normal(kx, (N, L, F), dtype=jnp.float32)
    conv_w = 0.1 * jax.random.normal(kcw, (n_att, F), dtype=jnp.float32)   # (n, F)
    conv_b = 0.1 * jax.random.normal(kcb, (n_att,), dtype=jnp.float32)     # (n,)
    w = _glorot_normal(kw, (n_att,))
    b = _glorot_normal(kb, (n_att,))

    # Pooling matmul uses bf16 MXU operands with f32 accumulation -> relaxed
    # tolerance vs the f32 reference (weights themselves are f32-path now).
    RTOL, ATOL = 5e-2, 5e-3

    outputs, weights = shifting_attention(x, conv_w, conv_b, w, b)
    outputs, weights = jax.block_until_ready((outputs, weights))

    ref_out, ref_wts = _ref_forward(x, conv_w, conv_b, w, b)
    np.testing.assert_allclose(np.asarray(outputs), np.asarray(ref_out), rtol=RTOL, atol=ATOL)
    np.testing.assert_allclose(np.asarray(weights), np.asarray(ref_wts), rtol=RTOL, atol=ATOL)
    assert outputs.shape == (N, n_att * F)
    assert weights.shape == (N, n_att, L)

    # Second config: multi-step grid via the two-TC split heuristic (default nb).
    N2 = 20
    x2 = jax.random.normal(jax.random.PRNGKey(1), (N2, L, F), dtype=jnp.float32)
    out2, wts2 = shifting_attention(x2, conv_w, conv_b, w, b)
    out2, wts2 = jax.block_until_ready((out2, wts2))
    ref_out2, ref_wts2 = _ref_forward(x2, conv_w, conv_b, w, b)
    np.testing.assert_allclose(np.asarray(out2), np.asarray(ref_out2), rtol=RTOL, atol=ATOL)
    np.testing.assert_allclose(np.asarray(wts2), np.asarray(ref_wts2), rtol=RTOL, atol=ATOL)
    assert out2.shape == (N2, n_att * F)
    assert wts2.shape == (N2, n_att, L)

    # Third config: small explicit nb exercises a 3-step grid and batch padding.
    out3, wts3 = shifting_attention(x2, conv_w, conv_b, w, b, nb=8)
    out3, wts3 = jax.block_until_ready((out3, wts3))
    np.testing.assert_allclose(np.asarray(out3), np.asarray(ref_out2), rtol=RTOL, atol=ATOL)
    np.testing.assert_allclose(np.asarray(wts3), np.asarray(ref_wts2), rtol=RTOL, atol=ATOL)

    print("KERNEL_OK")
</pallas_src>

<mosaic_0001>
module attributes {stable_mosaic.version = 11 : i64} {
  func.func @kernel(%arg0: i32, %arg1: memref<8x8x32xf32, #tpu.memory_space<vmem>>, %arg2: memref<32x4xf32, #tpu.memory_space<vmem>>, %arg3: memref<1x4xf32, #tpu.memory_space<vmem>>, %arg4: memref<4x1xf32, #tpu.memory_space<vmem>>, %arg5: memref<4x1xf32, #tpu.memory_space<vmem>>, %arg6: memref<8x128xf32, #tpu.memory_space<vmem>>, %arg7: memref<8x32xf32, #tpu.memory_space<vmem>>) attributes {dimension_semantics = [#tpu.dimension_semantics<parallel>], iteration_bounds = array<i64: 1>, scalar_prefetch = 0 : i64, scratch_operands = 0 : i64, tpu.core_type = #tpu.core_type<tc>, window_params = [{transform_indices = @transform_0, window_bounds = array<i64: 8, 8, 32>}, {pipeline_mode = #tpu.pipeline_mode<synchronous>, transform_indices = @transform_1, window_bounds = array<i64: 32, 4>}, {pipeline_mode = #tpu.pipeline_mode<synchronous>, transform_indices = @transform_2, window_bounds = array<i64: 1, 4>}, {pipeline_mode = #tpu.pipeline_mode<synchronous>, transform_indices = @transform_3, window_bounds = array<i64: 4, 1>}, {pipeline_mode = #tpu.pipeline_mode<synchronous>, transform_indices = @transform_4, window_bounds = array<i64: 4, 1>}, {transform_indices = @transform_5, window_bounds = array<i64: 8, 128>}, {transform_indices = @transform_6, window_bounds = array<i64: 8, 32>}]} {
    %c0 = arith.constant 0 : index
    %c0_0 = arith.constant 0 : index
    %c0_1 = arith.constant 0 : index
    %0 = vector.load %arg1[%c0, %c0_0, %c0_1] : memref<8x8x32xf32, #tpu.memory_space<vmem>>, vector<8x8x32xf32>
    %1 = vector.shape_cast %0 : vector<8x8x32xf32> to vector<64x32xf32>
    %c0_2 = arith.constant 0 : index
    %c0_3 = arith.constant 0 : index
    %2 = vector.load %arg2[%c0_2, %c0_3] : memref<32x4xf32, #tpu.memory_space<vmem>>, vector<32x4xf32>
    %cst = arith.constant dense<0.000000e+00> : vector<64x4xf32>
    %3 = tpu.matmul %1, %2, %cst {dimension_numbers = #tpu.dot_dimension_numbers<[1], [0], [0], [1], [0, 0, 1, 1], [], []>} : vector<64x32xf32>, vector<32x4xf32>, vector<64x4xf32> -> vector<64x4xf32>
    %4 = vector.shape_cast %3 : vector<64x4xf32> to vector<8x8x4xf32>
    %c0_4 = arith.constant 0 : index
    %c0_5 = arith.constant 0 : index
    %5 = vector.load %arg3[%c0_4, %c0_5] : memref<1x4xf32, #tpu.memory_space<vmem>>, vector<1x4xf32>
    %6 = vector.shape_cast %5 : vector<1x4xf32> to vector<1x1x4xf32>
    %7 = vector.broadcast %6 : vector<1x1x4xf32> to vector<8x8x4xf32>
    %8 = arith.addf %4, %7 : vector<8x8x4xf32>
    %cst_6 = arith.constant dense<0xFF800000> : vector<8x4xf32>
    %9 = vector.multi_reduction <maximumf>, %8, %cst_6 [1] : vector<8x8x4xf32> to vector<8x4xf32>
    %10 = vector.shape_cast %9 : vector<8x4xf32> to vector<8x1x4xf32>
    %11 = vector.broadcast %10 : vector<8x1x4xf32> to vector<8x8x4xf32>
    %12 = arith.subf %8, %11 : vector<8x8x4xf32>
    %13 = math.exp %12 : vector<8x8x4xf32>
    %cst_7 = arith.constant dense<0.000000e+00> : vector<8x4xf32>
    %14 = vector.multi_reduction <add>, %13, %cst_7 [1] : vector<8x8x4xf32> to vector<8x4xf32>
    %15 = vector.shape_cast %14 : vector<8x4xf32> to vector<8x1x4xf32>
    %16 = tpu.reciprocal %15 {approx = true} : vector<8x1x4xf32> -> vector<8x1x4xf32>
    %17 = vector.broadcast %16 : vector<8x1x4xf32> to vector<8x8x4xf32>
    %18 = arith.mulf %13, %17 : vector<8x8x4xf32>
    %19 = tpu.transpose %18, [0, 2, 1] : vector<8x8x4xf32> -> vector<8x4x8xf32>
    %20 = vector.shape_cast %19 : vector<8x4x8xf32> to vector<8x32xf32>
    %c0_8 = arith.constant 0 : index
    %c0_9 = arith.constant 0 : index
    %21 = vector.load %arg7[%c0_8, %c0_9] : memref<8x32xf32, #tpu.memory_space<vmem>>, vector<8x32xf32>
    tpu.vector_store %arg7[%c0_8, %c0_9], %20 {strides = array<i32>} : memref<8x32xf32, #tpu.memory_space<vmem>>, vector<8x32xf32>,
    %22 = arith.truncf %0 : vector<8x8x32xf32> to vector<8x8x32xbf16>
    %23 = arith.truncf %19 : vector<8x4x8xf32> to vector<8x4x8xbf16>
    %cst_10 = arith.constant dense<0.000000e+00> : vector<8x4x32xf32>
    %24 = tpu.matmul %23, %22, %cst_10 {dimension_numbers = #tpu.dot_dimension_numbers<[2], [1], [1], [2], [0, 0, 0, 1, 1, 2], [0], [0]>} : vector<8x4x8xbf16>, vector<8x8x32xbf16>, vector<8x4x32xf32> -> vector<8x4x32xf32>
    %c0_11 = arith.constant 0 : index
    %c0_12 = arith.constant 0 : index
    %25 = vector.load %arg4[%c0_11, %c0_12] : memref<4x1xf32, #tpu.memory_space<vmem>>, vector<4x1xf32>
    %26 = vector.shape_cast %25 : vector<4x1xf32> to vector<1x4x1xf32>
    %27 = vector.broadcast %26 : vector<1x4x1xf32> to vector<8x4x32xf32>
    %28 = arith.mulf %24, %27 : vector<8x4x32xf32>
    %c0_13 = arith.constant 0 : index
    %c0_14 = arith.constant 0 : index
    %29 = vector.load %arg5[%c0_13, %c0_14] : memref<4x1xf32, #tpu.memory_space<vmem>>, vector<4x1xf32>
    %30 = vector.shape_cast %29 : vector<4x1xf32> to vector<1x4x1xf32>
    %31 = vector.broadcast %30 : vector<1x4x1xf32> to vector<8x4x32xf32>
    %32 = arith.addf %28, %31 : vector<8x4x32xf32>
    %33 = arith.mulf %32, %32 : vector<8x4x32xf32>
    %cst_15 = arith.constant dense<0.000000e+00> : vector<8x4xf32>
    %34 = vector.multi_reduction <add>, %33, %cst_15 [2] : vector<8x4x32xf32> to vector<8x4xf32>
    %35 = vector.shape_cast %34 : vector<8x4xf32> to vector<8x4x1xf32>
    %36 = math.rsqrt %35 : vector<8x4x1xf32>
    %cst_16 = arith.constant 5.000000e-01 : f32
    %37 = vector.broadcast %cst_16 : f32 to vector<8x4x1xf32>
    %38 = arith.mulf %36, %37 : vector<8x4x1xf32>
    %39 = vector.broadcast %38 : vector<8x4x1xf32> to vector<8x4x32xf32>
    %40 = arith.mulf %32, %39 : vector<8x4x32xf32>
    %41 = vector.shape_cast %40 : vector<8x4x32xf32> to vector<8x128xf32>
    %c0_17 = arith.constant 0 : index
    %c0_18 = arith.constant 0 : index
    %42 = vector.load %arg6[%c0_17, %c0_18] : memref<8x128xf32, #tpu.memory_space<vmem>>, vector<8x128xf32>
    tpu.vector_store %arg6[%c0_17, %c0_18], %41 {strides = array<i32>} : memref<8x128xf32, #tpu.memory_space<vmem>>, vector<8x128xf32>,
    return
  }
  func.func @transform_0(%arg0: i32) -> (i32, i32, i32) {
    %c0_i32 = arith.constant 0 : i32
    %c0_i32_0 = arith.constant 0 : i32
    %c0_i32_1 = arith.constant 0 : i32
    return %arg0, %c0_i32, %c0_i32_0 : i32, i32, i32
  }
  func.func @transform_1(%arg0: i32) -> (i32, i32) {
    %c0_i32 = arith.constant 0 : i32
    %c0_i32_0 = arith.constant 0 : i32
    %c0_i32_1 = arith.constant 0 : i32
    return %c0_i32, %c0_i32_0 : i32, i32
  }
  func.func @transform_2(%arg0: i32) -> (i32, i32) {
    %c0_i32 = arith.constant 0 : i32
    %c0_i32_0 = arith.constant 0 : i32
    %c0_i32_1 = arith.constant 0 : i32
    return %c0_i32, %c0_i32_0 : i32, i32
  }
  func.func @transform_3(%arg0: i32) -> (i32, i32) {
    %c0_i32 = arith.constant 0 : i32
    %c0_i32_0 = arith.constant 0 : i32
    %c0_i32_1 = arith.constant 0 : i32
    return %c0_i32, %c0_i32_0 : i32, i32
  }
  func.func @transform_4(%arg0: i32) -> (i32, i32) {
    %c0_i32 = arith.constant 0 : i32
    %c0_i32_0 = arith.constant 0 : i32
    %c0_i32_1 = arith.constant 0 : i32
    return %c0_i32, %c0_i32_0 : i32, i32
  }
  func.func @transform_5(%arg0: i32) -> (i32, i32) {
    %c0_i32 = arith.constant 0 : i32
    %c0_i32_0 = arith.constant 0 : i32
    return %arg0, %c0_i32 : i32, i32
  }
  func.func @transform_6(%arg0: i32) -> (i32, i32) {
    %c0_i32 = arith.constant 0 : i32
    %c0_i32_0 = arith.constant 0 : i32
    return %arg0, %c0_i32 : i32, i32
  }
}

</mosaic_0001>

<bundles_post_ra>
// kernel: tpu_custom_call.1
= control target key start
LH: loop header
LB: loop body
LE: loop exit
PB: predicated region body
PF: predicated region fallthrough
CT: control target
= control target key end

     0   :  { %12 = vsyncpa [#allocation3], 0  ;;  %s1880_s0 = inlined_call_operand.hbm [shape: f32[8,8,32], index: 0, kind: input, shape index: {}]   ;;  %s1881_s1 = inlined_call_operand.vmem [shape: f32[32,4], index: 1, kind: input, shape index: {}]   ;;  %s1882_s2 = inlined_call_operand.vmem [shape: f32[1,4], index: 2, kind: input, shape index: {}]   ;;  %s1883_s3 = inlined_call_operand.vmem [shape: f32[4,1], index: 3, kind: input, shape index: {}]   ;;  %s1884_s4 = inlined_call_operand.vmem [shape: f32[4,1], index: 4, kind: input, shape index: {}]   ;;  %s1885_s5 = inlined_call_operand.hbm [shape: f32[8,128], index: 5, kind: output, shape index: {0}]   ;;  %s1886_s6 = inlined_call_operand.hbm [shape: f32[8,32], index: 6, kind: output, shape index: {1}]  }
   0x1   :  { %13 = vsyncpa [#allocation4], 0 }
   0x2   :  { %14 = vsyncpa [#allocation7], 0  ;;  %s1535_s21 = smov [#allocation2]   ;;  %s1463_s25 = scalar_lea.hbm %s1880_s0, 1024 }
   0x3   :  { %s20_s22 = sshll.u32 %s1535_s21, 4  ;;  %p1464_p0 = scmp.ne.s32.totalorder %s1880_s0, %s1463_s25  ;;  %s21_s22 = int_to_ptr.vmem [resolvable:$true] %s20_s22 }
   0x4   :  { %p1467_p1 = scmp.lt.u32.totalorder %s1463_s25, %s1880_s0 }
   0x6   :  { %p1469_p2 = pnand %p1467_p1, %p1464_p0 }
   0x8   :  { %1472 = shalt.err (!%p1469_p2)
}
   0x9   :  { %s1473_s30 = scalar_lea.vmem %s21_s22, 1024  ;;  %p1478_p4 = scmp.lt.s32.totalorder %s21_s22, %s21_s22 }
   0xa   :  { %p1474_p3 = scmp.ne.s32.totalorder %s21_s22, %s1473_s30  ;;  %p1479_p5 = scmp.lt.s32.totalorder %s1473_s30, %s1473_s30 }
   0xc   :  { %p1480_p6 = por %p1479_p5, %p1478_p4 }
   0xe   :  { %p1481_p7 = pnand %p1480_p6, %p1474_p3 }
  0x10   :  { %1484 = shalt.err (!%p1481_p7)
}
  0x11   :  { %s1536_s7 = smov 128   ;;  %s1537_s8 = smov 8  }
  0x12   :  { %26 = dma.hbm_to_vmem [thread:$0]  %s1880_s0, 1024, %s21_s22, [#allocation3], %s1536_s7, %s1536_s7, %s1537_s8  }
  0x13   :  { %1529 = dma.done.wait [#allocation3], 1024  }
  0x14   :  { %1530 = vsyncadd [#allocation3], 4294966272  ;;  %vm51_vm0 = vcmask 261120   ;;  %v47_v0 = vld [vmem:[%s1881_s1] sm:$0xff]  ;;  %v48_v1 = vld [vmem:[%s1881_s1 + $0x8] sm:$0xff]  ;;  %vm711_vm1 = vcmask 1043456  }
  0x15   :  { %v49_v2 = vld [vmem:[%s1881_s1 + $0x10] sm:$0xff]  ;;  %v1390_v3 = vpack.c.bf16 %v48_v1, %v47_v0  ;;  %v50_v4 = vld [vmem:[%s1881_s1 + $0x18] sm:$0xff]  ;;  %v39_v5 = vld [vmem:[#allocation2] sm:$0xff]  ;;  %v1538_v15 = vmov 0.0   ;;  %vm196_vm2 = vcmask 31744   ;;  %vm1539_vm3 = vmmov 0  }
  0x16   :  { %v1394_v6 = vpack.c.bf16 %v50_v4, %v49_v2  ;;  %1330 = vmatprep.mubr.msk.f32.mxu0 %vm51_vm0, %v39_v5  ;;  %v1611_v7 = vld [vmem:[#allocation2 + $0x8] sm:$0xff]  ;;  %v1613_v8 = vld [vmem:[#allocation2 + $0x10] sm:$0xff]  ;;  %v1619_v9 = vld [vmem:[#allocation2 + $0x18] sm:$0xff]  ;;  %v692_v14 = vpack.c.bf16 %v39_v5, %v39_v5  ;;  %1342 = vmatprep.subr.bf16.mxu1 %v1538_v15  ;;  %vm685_vm4 = vcmask 64512   ;;  %vm1113_vm5 = vcmask 257024   ;;  %s1545_s22 = smov 32  }
  0x17   :  { %1391 = vmatprep.subr.bf16.mxu0 %v1390_v3  ;;  %v1621_v10 = vld [vmem:[#allocation2 + $0x20] sm:$0xff]  ;;  %v1627_v11 = vld [vmem:[#allocation2 + $0x28] sm:$0xff]  ;;  %v1629_v12 = vld [vmem:[#allocation2 + $0x30] sm:$0xff]  ;;  %1344 = vmatprep.mubr.msk.bf16.mxu1 %vm1539_vm3, %v1538_v15  ;;  %s1546_s23 = smov 96   ;;  %s1547_s24 = smov 24   ;;  %vm1243_vm6 = vcmask 523264  }
  0x18   :  { %1393 = vmatpush3.bf16.msra.mxu0 %v1390_v3  ;;  %v1635_v13 = vld [vmem:[#allocation2 + $0x38] sm:$0xff]  ;;  %v713_v16 = vsel %vm711_vm1, %v692_v14, 0  ;;  %v1285_v17 = vld [vmem:[%s1882_s2] ss:$0 sm:$0xff]  ;;  %vm687_vm7 = vcmask 130048   ;;  %s1548_s25 = smov [#allocation5]  }
  0x19   :  { %1395 = vmatprep.subr.bf16.mxu0 %v1394_v6  ;;  %1343 = vmatpush3.bf16.msra.mxu1 %v713_v16  ;;  %s1254_s26 = sshll.u32 %s1548_s25, 4  ;;  %vm1245_vm8 = vcmask 785408   ;;  %vm689_vm9 = vcmask 195584   ;;  %s1549_s27 = smov [#allocation6]   ;;  %s1255_s26 = int_to_ptr.vmem [resolvable:$true] %s1254_s26 }
  0x1a   :  { %1348 = vmatprep.subr.bf16.mxu1 %v1538_v15  ;;  %s1264_s28 = sshll.u32 %s1549_s27, 4  ;;  %s1485_s29 = scalar_lea.vmem %s1255_s26, 128  ;;  %s1265_s28 = int_to_ptr.vmem [resolvable:$true] %s1264_s28 }
  0x1b   :  { %p1486_p8 = scmp.ne.s32.totalorder %s1255_s26, %s1485_s29  ;;  %p1490_p9 = scmp.lt.s32.totalorder %s1255_s26, %s1255_s26 }
  0x1c   :  { %1397 = vmatpush3.bf16.msra.mxu0 %v1394_v6  ;;  %p1491_p10 = scmp.lt.s32.totalorder %s1485_s29, %s1485_s29 }
  0x1d   :  { %1360 = vmatprep.subr.bf16.mxu0 %v1538_v15 }
  0x1e   :  { %p1492_p11 = por %p1491_p10, %p1490_p9 }
  0x1f   :  { %1331 = vmatmul.mubr.msk.f32.vlgmr.msra.gmra.mrb[0].mxu0 %vm51_vm0, %v1611_v7 }
  0x20   :  { %1333 = vmatprep.mubr.msk.f32.mxu0 %vm51_vm0, %v1613_v8  ;;  %p1493_p12 = pnand %p1492_p11, %p1486_p8 }
  0x23   :  { %1334 = vmatmul.mubr.msk.f32.gmra.mrb[2].mxu0 %vm51_vm0, %v1619_v9 }
  0x24   :  { %1336 = vmatprep.mubr.msk.f32.mxu0 %vm51_vm0, %v1621_v10 }
  0x27   :  { %1337 = vmatmul.mubr.msk.f32.gmra.mrb[4].mxu0 %vm51_vm0, %v1627_v11 }
  0x28   :  { %1339 = vmatprep.mubr.msk.f32.mxu0 %vm51_vm0, %v1629_v12 }
  0x2b   :  { %1340 = vmatmul.mubr.msk.f32.gmra.mrb[6].mxu0 %vm51_vm0, %v1635_v13 }
  0x2c   :  { %1362 = vmatprep.mubr.msk.bf16.mxu0 %vm1539_vm3, %v1538_v15 }
  0xf2   :  { %v1332_v18 = vpop.f32.mrb[0].mxu0 }
  0xf3   :  { %v189_v19 = vadd.f32 %v1332_v18, %v1285_v17  ;;  %v142_v20 = vpop.f32.mrb[1].mxu0 }
  0xf4   :  { %v188_v21 = vadd.f32 %v1285_v17, %v142_v20 }
  0xf5   :  { %v204_v22 = vsel %vm196_vm2, %v189_v19, -inf }
  0xf6   :  { %v205_v23 = vrot.slane %v204_v22, 4  ;;  %v197_v24 = vsel %vm196_vm2, %v188_v21, -inf  ;;  %v1335_v25 = vpop.f32.mrb[2].mxu0 }
  0xf7   :  { %v198_v26 = vrot.slane %v197_v24, 4  ;;  %v191_v27 = vadd.f32 %v1335_v25, %v1285_v17  ;;  %v152_v28 = vpop.f32.mrb[3].mxu0 }
  0xf8   :  { %v206_v29 = vmax.f32 %v204_v22, %v205_v23  ;;  %v190_v30 = vadd.f32 %v1285_v17, %v152_v28 }
  0xf9   :  { %v199_v31 = vmax.f32 %v197_v24, %v198_v26  ;;  %v218_v32 = vsel %vm196_vm2, %v191_v27, -inf }
  0xfa   :  { %v207_v33 = vrot.slane %v206_v29, 2  ;;  %v219_v34 = vrot.slane %v218_v32, 4  ;;  %v211_v35 = vsel %vm196_vm2, %v190_v30, -inf  ;;  %v1338_v36 = vpop.f32.mrb[4].mxu0 }
  0xfb   :  { %v200_v37 = vrot.slane %v199_v31, 2  ;;  %v212_v38 = vrot.slane %v211_v35, 4  ;;  %v193_v39 = vadd.f32 %v1338_v36, %v1285_v17  ;;  %v162_v40 = vpop.f32.mrb[5].mxu0 }
  0xfc   :  { %v208_v41 = vmax.f32 %v206_v29, %v207_v33  ;;  %v220_v42 = vmax.f32 %v218_v32, %v219_v34  ;;  %v192_v43 = vadd.f32 %v1285_v17, %v162_v40 }
  0xfd   :  { %v201_v44 = vmax.f32 %v199_v31, %v200_v37  ;;  %v213_v45 = vmax.f32 %v211_v35, %v212_v38  ;;  %v232_v46 = vsel %vm196_vm2, %v193_v39, -inf }
  0xfe   :  { %v209_v47 = vrot.slane %v208_v41, 1  ;;  %v221_v48 = vrot.slane %v220_v42, 2  ;;  %v233_v49 = vrot.slane %v232_v46, 4  ;;  %v225_v50 = vsel %vm196_vm2, %v192_v43, -inf  ;;  %v1341_v51 = vpop.f32.mrb[6].mxu0 }
  0xff   :  { %v202_v52 = vrot.slane %v201_v44, 1  ;;  %v214_v53 = vrot.slane %v213_v45, 2  ;;  %v226_v54 = vrot.slane %v225_v50, 4  ;;  %v195_v55 = vadd.f32 %v1341_v51, %v1285_v17  ;;  %v172_v56 = vpop.f32.mrb[7].mxu0 }
 0x100   :  { %v210_v57 = vmax.f32 %v208_v41, %v209_v47  ;;  %v222_v58 = vmax.f32 %v220_v42, %v221_v48  ;;  %v234_v59 = vmax.f32 %v232_v46, %v233_v49  ;;  %v194_v60 = vadd.f32 %v1285_v17, %v172_v56 }
 0x101   :  { %v203_v61 = vmax.f32 %v201_v44, %v202_v52  ;;  %v215_v62 = vmax.f32 %v213_v45, %v214_v53  ;;  %v227_v63 = vmax.f32 %v225_v50, %v226_v54  ;;  %v246_v0 = vsel %vm196_vm2, %v195_v55, -inf }
 0x102   :  { %v254_v1 = vsub.f32 %v189_v19, %v210_v57  ;;  %v223_v2 = vrot.slane %v222_v58, 1  ;;  %v235_v3 = vrot.slane %v234_v59, 2  ;;  %v247_v4 = vrot.slane %v246_v0, 4 }
 0x103   :  { %v253_v5 = vsub.f32 %v188_v21, %v203_v61  ;;  %v216_v6 = vrot.slane %v215_v62, 1  ;;  %v228_v14 = vrot.slane %v227_v63, 2  ;;  %v239_v16 = vsel %vm196_vm2, %v194_v60, -inf }
 0x104   :  { %v263_v18 = vmul.f32 1.442695, %v254_v1  ;;  %v224_v20 = vmax.f32 %v222_v58, %v223_v2  ;;  %v236_v22 = vmax.f32 %v234_v59, %v235_v3  ;;  %v248_v23 = vmax.f32 %v246_v0, %v247_v4 }
 0x105   :  { %v261_v24 = vmul.f32 1.442695, %v253_v5  ;;  %v217_v17 = vmax.f32 %v215_v62, %v216_v6  ;;  %v229_v25 = vmax.f32 %v227_v63, %v228_v14  ;;  %v240_v26 = vrot.slane %v239_v16, 4 }
 0x106   :  { %1415 = vpow2.f32 %v263_v18  ;;  %v256_v28 = vsub.f32 %v191_v27, %v224_v20  ;;  %v237_v29 = vrot.slane %v236_v22, 1  ;;  %v249_v19 = vrot.slane %v248_v23, 2 }
 0x107   :  { %1417 = vpow2.f32 %v261_v24  ;;  %v255_v31 = vsub.f32 %v190_v30, %v217_v17  ;;  %v230_v32 = vrot.slane %v229_v25, 1  ;;  %v241_v21 = vmax.f32 %v239_v16, %v240_v26 }
 0x108   :  { %v267_v33 = vmul.f32 1.442695, %v256_v28  ;;  %v238_v34 = vmax.f32 %v236_v22, %v237_v29  ;;  %v250_v35 = vmax.f32 %v248_v23, %v249_v19 }
 0x109   :  { %v265_v36 = vmul.f32 1.442695, %v255_v31  ;;  %v231_v37 = vmax.f32 %v229_v25, %v230_v32  ;;  %v242_v38 = vrot.slane %v241_v21, 2 }
 0x10a   :  { %1419 = vpow2.f32 %v267_v33  ;;  %v258_v40 = vsub.f32 %v193_v39, %v238_v34  ;;  %v251_v41 = vrot.slane %v250_v35, 1 }
 0x10b   :  { %1421 = vpow2.f32 %v265_v36  ;;  %v257_v42 = vsub.f32 %v192_v43, %v231_v37  ;;  %v243_v44 = vmax.f32 %v241_v21, %v242_v38 }
 0x10c   :  { %v271_v45 = vmul.f32 1.442695, %v258_v40  ;;  %v252_v27 = vmax.f32 %v250_v35, %v251_v41 }
 0x10d   :  { %v269_v46 = vmul.f32 1.442695, %v257_v42  ;;  %v244_v47 = vrot.slane %v243_v44, 1 }
 0x10e   :  { %1423 = vpow2.f32 %v271_v45  ;;  %v260_v30 = vsub.f32 %v195_v55, %v252_v27 }
 0x10f   :  { %1425 = vpow2.f32 %v269_v46  ;;  %v245_v48 = vmax.f32 %v243_v44, %v244_v47 }
 0x110   :  { %v1654_v49 = vpop.eup %1415  ;;  %v275_v50 = vmul.f32 1.442695, %v260_v30 }
 0x111   :  { %v1656_v51 = vpop.eup %1417  ;;  %v284_v39 = vsel %vm196_vm2, %v1654_v49, 0.0  ;;  %v259_v52 = vsub.f32 %v194_v60, %v245_v48 }
 0x112   :  { %v285_v53 = vrot.slane %v284_v39, 4  ;;  %v277_v43 = vsel %vm196_vm2, %v1656_v51, 0.0  ;;  %1427 = vpow2.f32 %v275_v50 }
 0x113   :  { %v278_v54 = vrot.slane %v277_v43, 4  ;;  %v273_v56 = vmul.f32 1.442695, %v259_v52 }
 0x114   :  { %v1662_v57 = vpop.eup %1419  ;;  %v286_v55 = vadd.f32 %v285_v53, %v284_v39 }
 0x115   :  { %v1664_v58 = vpop.eup %1421  ;;  %v298_v59 = vsel %vm196_vm2, %v1662_v57, 0.0  ;;  %1429 = vpow2.f32 %v273_v56  ;;  %v279_v61 = vadd.f32 %v278_v54, %v277_v43 }
 0x116   :  { %v299_v62 = vrot.slane %v298_v59, 4  ;;  %v291_v60 = vsel %vm196_vm2, %v1664_v58, 0.0  ;;  %v287_v63 = vrot.slane %v286_v55, 2 }
 0x117   :  { %v292_v0 = vrot.slane %v291_v60, 4  ;;  %v280_v1 = vrot.slane %v279_v61, 2 }
 0x118   :  { %v1670_v2 = vpop.eup %1423  ;;  %v300_v3 = vadd.f32 %v299_v62, %v298_v59  ;;  %v288_v4 = vadd.f32 %v287_v63, %v286_v55 }
 0x119   :  { %v1672_v5 = vpop.eup %1425  ;;  %v312_v6 = vsel %vm196_vm2, %v1670_v2, 0.0  ;;  %v281_v14 = vadd.f32 %v280_v1, %v279_v61  ;;  %v293_v16 = vadd.f32 %v292_v0, %v291_v60  ;;  %v695_v1 = vpack.c.bf16 %v1619_v9, %v1619_v9 }
 0x11a   :  { %v313_v18 = vrot.slane %v312_v6, 4  ;;  %v305_v20 = vsel %vm196_vm2, %v1672_v5, 0.0  ;;  %v289_v22 = vrot.slane %v288_v4, 1  ;;  %v301_v23 = vrot.slane %v300_v3, 2 }
 0x11b   :  { %v306_v24 = vrot.slane %v305_v20, 4  ;;  %v282_v17 = vrot.slane %v281_v14, 1  ;;  %v294_v25 = vrot.slane %v293_v16, 2  ;;  %v851_v9 = vsel %vm711_vm1, %v695_v1, 0 }
 0x11c   :  { %v1678_v26 = vpop.eup %1427  ;;  %v314_v28 = vadd.f32 %v313_v18, %v312_v6  ;;  %v290_v29 = vadd.f32 %v289_v22, %v288_v4  ;;  %v302_v19 = vadd.f32 %v301_v23, %v300_v3  ;;  %1361 = vmatpush3.bf16.msra.mxu0 %v851_v9 }
 0x11d   :  { %v307_v31 = vadd.f32 %v306_v24, %v305_v20  ;;  %v326_v32 = vsel %vm196_vm2, %v1678_v26, 0.0  ;;  %v283_v21 = vadd.f32 %v282_v17, %v281_v14  ;;  %v295_v33 = vadd.f32 %v294_v25, %v293_v16  ;;  %1372 = vmatprep.subr.bf16.mxu0 %v1538_v15  ;;  %v1077_v17 = vld [vmem:[%s1883_s3] sm:$0xf]  ;;  %s1543_s3 = smov 16  }
 0x11e   :  { %v327_v34 = vrot.slane %v326_v32, 4  ;;  %v303_v35 = vrot.slane %v302_v19, 1  ;;  %v315_v36 = vrot.slane %v314_v28, 2  ;;  %v1541_v25 = vmov 1983009808  }
 0x11f   :  { %v1430_v37 = vpop.eup %1429  ;;  %1431 = vrcp.f32 %v283_v21  ;;  %v296_v38 = vrot.slane %v295_v33, 1  ;;  %v308_v40 = vrot.slane %v307_v31, 2 }
 0x120   :  { %v328_v41 = vadd.f32 %v327_v34, %v326_v32  ;;  %v319_v42 = vsel %vm196_vm2, %v1430_v37, 0.0  ;;  %1433 = vrcp.f32 %v290_v29  ;;  %v316_v44 = vadd.f32 %v315_v36, %v314_v28 }
 0x121   :  { %v320_v45 = vrot.slane %v319_v42, 4  ;;  %v297_v27 = vadd.f32 %v296_v38, %v295_v33  ;;  %v304_v46 = vadd.f32 %v303_v35, %v302_v19  ;;  %v309_v47 = vadd.f32 %v308_v40, %v307_v31 }
 0x122   :  { %v317_v30 = vrot.slane %v316_v44, 1  ;;  %v329_v48 = vrot.slane %v328_v41, 2  ;;  %v607_v28 = vunpack.c.l.s4 %v1541_v25  ;;  %v697_v35 = vpack.c.bf16 %v1627_v11, %v1627_v11 }
 0x123   :  { %v321_v50 = vadd.f32 %v320_v45, %v319_v42  ;;  %1435 = vrcp.f32 %v297_v27  ;;  %v310_v39 = vrot.slane %v309_v47, 1 }
 0x124   :  { %v330_v52 = vadd.f32 %v329_v48, %v328_v41  ;;  %1437 = vrcp.f32 %v304_v46  ;;  %v318_v43 = vadd.f32 %v317_v30, %v316_v44  ;;  %v608_v32 = vunpack.c.0.s8 %v607_v28 }
 0x125   :  { %v311_v53 = vadd.f32 %v310_v39, %v309_v47  ;;  %v322_v54 = vrot.slane %v321_v50, 2  ;;  %v943_v27 = vsel %vm711_vm1, %v697_v35, 0  ;;  %v1542_v46 = vmov 1934713408  }
 0x126   :  { %v331_v56 = vrot.slane %v330_v52, 1  ;;  %v640_v47 = vunpack.c.l.s4 %v1542_v46  ;;  %v696_v30 = vpack.c.bf16 %v1621_v10, %v1621_v10 }
 0x127   :  { %1439 = vrcp.f32 %v311_v53  ;;  %v323_v55 = vadd.f32 %v322_v54, %v321_v50  ;;  %v699_v50 = vpack.c.bf16 %v1635_v13, %v1635_v13 }
 0x128   :  { %v332_v59 = vadd.f32 %v331_v56, %v330_v52  ;;  %1441 = vrcp.f32 %v318_v43  ;;  %v641_v10 = vunpack.c.0.s8 %v640_v47 }
 0x129   :  { %v1432_v61 = vpop.eup %1431  ;;  %v324_v62 = vrot.slane %v323_v55, 1 }
 0x12a   :  { %v1434_v60 = vpop.eup %1433  ;;  %v341_v63 = vmul.f32 %v1432_v61, %v1656_v51  ;;  %1443 = vrcp.f32 %v332_v59 }
 0x12b   :  { %v325_v0 = vadd.f32 %v324_v62, %v323_v55  ;;  %v342_v4 = vmul.f32 %v1434_v60, %v1654_v49  ;;  %v897_v55 = vsel %vm711_vm1, %v696_v30, 0  ;;  %v1035_v62 = vsel %vm711_vm1, %v699_v50, 0 }
 0x12c   :  { %349 = vxpose.xlu0.b32.start.end [1/1] (short) (narrow) %v341_v63, 8 }
 0x12d   :  { %v1436_v3 = vpop.eup %1435  ;;  %1445 = vrcp.f32 %v325_v0  ;;  %v698_v0 = vpack.c.bf16 %v1629_v12, %v1629_v12 }
 0x12e   :  { %v343_v6 = vmul.f32 %v1436_v3, %v1664_v58  ;;  %v1438_v51 = vpop.eup %1437 }
 0x12f   :  { %v344_v16 = vmul.f32 %v1438_v51, %v1662_v57  ;;  %v1091_v57 = vld [vmem:[%s1884_s4] sm:$0xf]  ;;  %s1544_s4 = smov 64  }
 0x130   :  { %381 = vxpose.xlu0.b32.start.end [1/1] (short) (narrow) %v342_v4, 8  ;;  %413 = vxpose.xlu1.b32.start.end [1/1] (short) (narrow) %v343_v6, 8 }
 0x131   :  { %v1440_v14 = vpop.eup %1439 }
 0x132   :  { %v345_v49 = vmul.f32 %v1440_v14, %v1672_v5  ;;  %v1442_v58 = vpop.eup %1441  ;;  %v1540_v5 = vmov 0  }
 0x133   :  { %v346_v20 = vmul.f32 %v1442_v58, %v1670_v2  ;;  %v693_v2 = vpack.c.bf16 %v1611_v7, %v1611_v7  ;;  %v694_v7 = vpack.c.bf16 %v1613_v8, %v1613_v8 }
 0x134   :  { %445 = vxpose.xlu1.b32.start.end [1/1] (short) (narrow) %v344_v16, 8  ;;  %477 = vxpose.xlu0.b32.start.end [1/1] (short) (narrow) %v345_v49, 8  ;;  %v1444_v18 = vpop.eup %1443  ;;  %v989_v16 = vsel %vm711_vm1, %v698_v0, 0 }
 0x135   :  { %v348_v24 = vmul.f32 %v1444_v18, %v1678_v26  ;;  %v609_v26 = vlaneseq  ;;  %v759_v31 = vsel %vm711_vm1, %v693_v2, 0  ;;  %v805_v45 = vsel %vm711_vm1, %v694_v7, 0 }
 0x137   :  { %v1446_v22 = vpop.eup %1445  ;;  %v610_v21 = vshrl.u32 %v609_v26, 7 }
 0x138   :  { %509 = vxpose.xlu1.b32.start.end [1/1] (short) (narrow) %v346_v20, 8  ;;  %v347_v23 = vmul.f32 %v1446_v22, %v1430_v37 }
 0x139   :  { %v1715_v37 = vsub.s32 %v608_v32, %v610_v21  ;;  %v1736_v60 = vsub.s32 %v641_v10, %v610_v21 }
 0x13a   :  { %541 = vxpose.xlu0.b32.start.end [1/1] (short) (narrow) %v347_v23, 8 }
 0x13c   :  { %573 = vxpose.xlu1.b32.start.end [1/1] (short) (narrow) %v348_v24, 8 }
 0x15a   :  { %1414 = vset.pattern.permute.xlu1 %v1540_v5 }
 0x15b   :  { %1094 = vperm.xlu1 %1414, %v1091_v57  }
 0x163   :  { %1413 = vset.pattern.permute.xlu0 %v1540_v5 }
 0x164   :  { %1080 = vperm.xlu0 %1413, %v1077_v17  }
 0x1ac   :  { %v365_v29 = vpop.trf.xlu0 }
 0x1ad   :  { %v700_v19 = vpack.c.bf16 %v365_v29, %v365_v29 }
 0x1af   :  { %1345 = vmatmul.mubr.msk.bf16.vlgmr.msra.gmra.mrb[0].mxu1 %vm685_vm4, %v700_v19 }
 0x1b0   :  { %1349 = vmatpush3.bf16.msra.mxu1 %v759_v31  ;;  %v429_v33 = vpop.trf.xlu1  ;;  %v397_v34 = vpop.trf.xlu0  ;;  %1350 = vmatprep.mubr.msk.bf16.mxu1 %vm1539_vm3, %v1538_v15 }
 0x1b1   :  { %v605_v36 = vcombine.low %v365_v29, %v429_v33  ;;  %1354 = vmatprep.subr.bf16.mxu1 %v1538_v15  ;;  %v701_v38 = vpack.c.bf16 %v397_v34, %v397_v34  ;;  %v702_v13 = vpack.c.bf16 %v429_v33, %v429_v33 }
 0x1b3   :  { %v612_v8 = vrot.slane %v605_v36, %v1715_v37 }
 0x1b4   :  { %v461_v40 = vpop.trf.xlu1  ;;  %v493_v41 = vpop.trf.xlu0 }
 0x1b5   :  { %v613_v42 = vcombine.low %v397_v34, %v461_v40  ;;  %v703_v44 = vpack.c.bf16 %v461_v40, %v461_v40  ;;  %v704_v4 = vpack.c.bf16 %v493_v41, %v493_v41 }
 0x1b7   :  { %v620_v11 = vrot.slane %v613_v42, %v1715_v37  ;;  %1351 = vmatmul.mubr.msk.bf16.vlgmr.msra.gmra.mrb[4].mxu1 %vm685_vm4, %v701_v38  ;;  %1363 = vmatmul.mubr.msk.bf16.vlgmr.msra.gmra.mrb[8].mxu0 %vm685_vm4, %v703_v44 }
 0x1b8   :  { %1355 = vmatpush3.bf16.msra.mxu1 %v805_v45  ;;  %v525_v48 = vpop.trf.xlu1  ;;  %1373 = vmatpush3.bf16.msra.mxu0 %v943_v27 }
 0x1b9   :  { %v638_v39 = vcombine.high %v612_v8, %v620_v11  ;;  %1356 = vmatprep.mubr.msk.bf16.mxu1 %vm1539_vm3, %v1538_v15  ;;  %1366 = vmatprep.subr.bf16.mxu1 %v1538_v15  ;;  %v637_v52 = vcombine.low %v612_v8, %v620_v11  ;;  %v705_v43 = vpack.c.bf16 %v525_v48, %v525_v48 }
 0x1ba   :  { %v557_v53 = vpop.trf.xlu0  ;;  %1374 = vmatprep.mubr.msk.bf16.mxu0 %vm1539_vm3, %v1538_v15  ;;  %1384 = vmatprep.subr.bf16.mxu0 %v1538_v15 }
 0x1bb   :  { %v621_v54 = vcombine.low %v493_v41, %v557_v53  ;;  %v1749_v6 = vrot.slane %v638_v39, %v1736_v60  ;;  %v1755_v12 = vrot.slane %v637_v52, %v1736_v60  ;;  %v706_v22 = vpack.c.bf16 %v557_v53, %v557_v53 }
 0x1bc   :  { %v589_v56 = vpop.trf.xlu1 }
 0x1bd   :  { %v629_v59 = vcombine.low %v525_v48, %v589_v56  ;;  %v628_v61 = vrot.slane %v621_v54, %v1715_v37  ;;  %v707_v51 = vpack.c.bf16 %v589_v56, %v589_v56 }
 0x1bf   :  { %v636_v63 = vrot.slane %v629_v59, %v1715_v37  ;;  %1357 = vmatmul.mubr.msk.bf16.vlgmr.msra.gmra.mrb[8].mxu1 %vm685_vm4, %v702_v13  ;;  %1375 = vmatmul.mubr.msk.bf16.vlgmr.msra.gmra.mrb[12].mxu0 %vm685_vm4, %v705_v43 }
 0x1c0   :  { %1367 = vmatpush3.bf16.msra.mxu1 %v897_v55  ;;  %1385 = vmatpush3.bf16.msra.mxu0 %v1035_v62 }
 0x1c1   :  { %v654_v1 = vcombine.high %v628_v61, %v636_v63  ;;  %1368 = vmatprep.mubr.msk.bf16.mxu1 %vm1539_vm3, %v1538_v15  ;;  %1378 = vmatprep.subr.bf16.mxu1 %v1538_v15  ;;  %v653_v3 = vcombine.low %v628_v61, %v636_v63 }
 0x1c2   :  { %1386 = vmatprep.mubr.msk.bf16.mxu0 %vm1539_vm3, %v1538_v15 }
 0x1c3   :  { %v1752_v9 = vrot.slane %v654_v1, %v1736_v60  ;;  %v1758_v14 = vrot.slane %v653_v3, %v1736_v60 }
 0x1c5   :  { %v671_v49 = vcombine.low %v1749_v6, %v1752_v9  ;;  %v669_v58 = vcombine.low %v1755_v12, %v1758_v14  ;;  %v670_v18 = vcombine.high %v1755_v12, %v1758_v14  ;;  %v672_v20 = vcombine.high %v1749_v6, %v1752_v9 }
 0x1c7   :  { %1369 = vmatmul.mubr.msk.bf16.vlgmr.msra.gmra.mrb[12].mxu1 %vm685_vm4, %v704_v4  ;;  %1387 = vmatmul.mubr.msk.bf16.vlgmr.msra.gmra.mrb[16].mxu0 %vm685_vm4, %v707_v51 }
 0x1c8   :  { %1379 = vmatpush3.bf16.msra.mxu1 %v989_v16  ;;  %1380 = vmatprep.mubr.msk.bf16.mxu1 %vm1539_vm3, %v1538_v15 }
 0x1cf   :  { %1381 = vmatmul.mubr.msk.bf16.vlgmr.msra.gmra.mrb[16].mxu1 %vm685_vm4, %v706_v22 }
 0x1da   :  { %v1776_v57 = vpop.permute.xlu1 %1094 }
 0x1e3   :  { %v1774_v23 = vpop.permute.xlu0 %1080 }
 0x282   :  { %v749_v24 = vpop.f32.mrb[0].mxu1 }
 0x283   :  { %v1346_v5 = vpop.f32.mrb[1].mxu1  ;;  %v1083_v17 = vmul.f32 %v1774_v23, %v749_v24 }
 0x284   :  { %v752_v2 = vpop.f32.mrb[2].mxu1 }
 0x285   :  { %v1347_v25 = vpop.f32.mrb[3].mxu1  ;;  %v1780_v28 = vadd.f32 %v1776_v57, %v1083_v17 }
 0x287   :  { %v1105_v15 = vmul.f32 %v1780_v28, %v1780_v28 }
 0x289   :  { %v1114_v26 = vsel %vm1113_vm5, %v1105_v15, 0.0 }
 0x28a   :  { %v795_v29 = vpop.f32.mrb[4].mxu1  ;;  %v887_v19 = vpop.f32.mrb[8].mxu0  ;;  %1115 = vadd.xlane.f32.xlu1 %v1114_v26 }
 0x28b   :  { %v1084_v31 = vmul.f32 %v1774_v23, %v795_v29  ;;  %v1086_v32 = vmul.f32 %v1774_v23, %v887_v19  ;;  %v1352_v21 = vpop.f32.mrb[5].mxu1  ;;  %v1364_v33 = vpop.f32.mrb[9].mxu0 }
 0x28c   :  { %v798_v34 = vpop.f32.mrb[6].mxu1  ;;  %v890_v7 = vpop.f32.mrb[10].mxu0 }
 0x28d   :  { %v1788_v35 = vadd.f32 %v1776_v57, %v1084_v31  ;;  %v1791_v36 = vadd.f32 %v1776_v57, %v1086_v32  ;;  %v1353_v38 = vpop.f32.mrb[7].mxu1  ;;  %v1365_v40 = vpop.f32.mrb[11].mxu0 }
 0x28f   :  { %v1106_v41 = vmul.f32 %v1788_v35, %v1788_v35  ;;  %v1108_v42 = vmul.f32 %v1791_v36, %v1791_v36 }
 0x291   :  { %v1117_v44 = vsel %vm1113_vm5, %v1106_v41, 0.0  ;;  %v1123_v45 = vsel %vm1113_vm5, %v1108_v42, 0.0 }
 0x292   :  { %v841_v27 = vpop.f32.mrb[8].mxu1  ;;  %v979_v46 = vpop.f32.mrb[12].mxu0  ;;  %1118 = vadd.xlane.f32.xlu0 %v1117_v44  ;;  %1124 = vadd.xlane.f32.xlu1 %v1123_v45 }
 0x293   :  { %v1085_v47 = vmul.f32 %v1774_v23, %v841_v27  ;;  %v1088_v8 = vmul.f32 %v1774_v23, %v979_v46  ;;  %v1358_v11 = vpop.f32.mrb[9].mxu1  ;;  %v1376_v30 = vpop.f32.mrb[13].mxu0 }
 0x294   :  { %v844_v48 = vpop.f32.mrb[10].mxu1  ;;  %v982_v50 = vpop.f32.mrb[14].mxu0 }
 0x295   :  { %v1802_v39 = vadd.f32 %v1776_v57, %v1085_v47  ;;  %v1805_v52 = vadd.f32 %v1776_v57, %v1088_v8  ;;  %v1359_v53 = vpop.f32.mrb[11].mxu1  ;;  %v1377_v10 = vpop.f32.mrb[15].mxu0 }
 0x297   :  { %v1110_v43 = vmul.f32 %v1805_v52, %v1805_v52  ;;  %v1107_v56 = vmul.f32 %v1802_v39, %v1802_v39 }
 0x299   :  { %v1129_v54 = vsel %vm1113_vm5, %v1110_v43, 0.0  ;;  %v1120_v16 = vsel %vm1113_vm5, %v1107_v56, 0.0 }
 0x29a   :  { %v933_v55 = vpop.f32.mrb[12].mxu1  ;;  %v1071_v13 = vpop.f32.mrb[16].mxu0  ;;  %1130 = vadd.xlane.f32.xlu1 %v1129_v54 }
 0x29b   :  { %v1087_v59 = vmul.f32 %v1774_v23, %v933_v55  ;;  %v1090_v61 = vmul.f32 %v1774_v23, %v1071_v13  ;;  %v1370_v62 = vpop.f32.mrb[13].mxu1  ;;  %v1388_v63 = vpop.f32.mrb[17].mxu0 }
 0x29c   :  { %v936_v0 = vpop.f32.mrb[14].mxu1  ;;  %v1074_v1 = vpop.f32.mrb[18].mxu0 }
 0x29d   :  { %v1815_v3 = vadd.f32 %v1776_v57, %v1087_v59  ;;  %v1104_v4 = vadd.f32 %v1776_v57, %v1090_v61  ;;  %v1371_v51 = vpop.f32.mrb[15].mxu1  ;;  %v1389_v22 = vpop.f32.mrb[19].mxu0 }
 0x29e   :  { %1121 = vadd.xlane.f32.xlu1 %v1120_v16 }
 0x29f   :  { %v1109_v24 = vmul.f32 %v1815_v3, %v1815_v3  ;;  %v1112_v5 = vmul.f32 %v1104_v4, %v1104_v4 }
 0x2a1   :  { %v1126_v17 = vsel %vm1113_vm5, %v1109_v24, 0.0  ;;  %v1135_v2 = vsel %vm1113_vm5, %v1112_v5, 0.0 }
 0x2a2   :  { %v1025_v25 = vpop.f32.mrb[16].mxu1  ;;  %1127 = vadd.xlane.f32.xlu0 %v1126_v17  ;;  %1136 = vadd.xlane.f32.xlu1 %v1135_v2 }
 0x2a3   :  { %v1089_v15 = vmul.f32 %v1774_v23, %v1025_v25  ;;  %v1382_v26 = vpop.f32.mrb[17].mxu1 }
 0x2a4   :  { %v1028_v29 = vpop.f32.mrb[18].mxu1 }
 0x2a5   :  { %v1103_v19 = vadd.f32 %v1776_v57, %v1089_v15  ;;  %v1383_v31 = vpop.f32.mrb[19].mxu1 }
 0x2a7   :  { %v1111_v32 = vmul.f32 %v1103_v19, %v1103_v19 }
 0x2a9   :  { %v1132_v21 = vsel %vm1113_vm5, %v1111_v32, 0.0 }
 0x2aa   :  { %1133 = vadd.xlane.f32.xlu0 %v1132_v21 }
 0x2b3   :  { %678 = vrot.lane.b32.xlu1 %v671_v49, %s1543_s3 }
 0x2c0   :  { %674 = vrot.lane.b32.xlu0 %v670_v18, %s1537_s8 }
 0x317   :  { %v1116_v23 = vpop.xlane.xlu1 %1115 }
 0x318   :  { %1447 = vrsqrt.f32 %v1116_v23 }
 0x31f   :  { %v1125_v33 = vpop.xlane.xlu1 %1124  ;;  %v1119_v7 = vpop.xlane.xlu0 %1118 }
 0x322   :  { %v1448_v49 = vpop.eup %1447 }
 0x323   :  { %v1146_v46 = vmul.f32 0.5, %v1448_v49 }
 0x325   :  { %v1154_v53 = vmul.f32 %v1146_v46, %v1780_v28 }
 0x327   :  { %v1131_v34 = vpop.xlane.xlu1 %1130 }
 0x32b   :  { %v1122_v57 = vpop.xlane.xlu1 %1121 }
 0x32c   :  { %1449 = vrsqrt.f32 %v1122_v57 }
 0x32d   :  { %1451 = vrsqrt.f32 %v1119_v7 }
 0x32e   :  { %1453 = vrsqrt.f32 %v1125_v33 }
 0x32f   :  { %v1137_v38 = vpop.xlane.xlu1 %1136  ;;  %v1128_v40 = vpop.xlane.xlu0 %1127 }
 0x330   :  { %1455 = vrsqrt.f32 %v1137_v38 }
 0x331   :  { %1457 = vrsqrt.f32 %v1131_v34 }
 0x332   :  { %1459 = vrsqrt.f32 %v1128_v40 }
 0x333   :  { %v679_v29 = vpop.permute.xlu1 %678 }
 0x336   :  { %v1450_v41 = vpop.eup %1449 }
 0x337   :  { %v1452_v42 = vpop.eup %1451  ;;  %v1134_v44 = vpop.xlane.xlu0 %1133  ;;  %v1148_v18 = vmul.f32 0.5, %v1450_v41 }
 0x338   :  { %v1454_v45 = vpop.eup %1453  ;;  %1461 = vrsqrt.f32 %v1134_v44  ;;  %v1147_v47 = vmul.f32 0.5, %v1452_v42 }
 0x339   :  { %v1149_v8 = vmul.f32 0.5, %v1454_v45  ;;  %v1156_v30 = vmul.f32 %v1148_v18, %v1802_v39 }
 0x33a   :  { %v1456_v27 = vpop.eup %1455  ;;  %v1155_v10 = vmul.f32 %v1147_v47, %v1788_v35 }
 0x33b   :  { %v1458_v11 = vpop.eup %1457  ;;  %v1153_v48 = vmul.f32 0.5, %v1456_v27  ;;  %v1157_v43 = vmul.f32 %v1149_v8, %v1791_v36  ;;  %v1162_v56 = vcombine.low %v1154_v53, %v1156_v30 }
 0x33c   :  { %v1460_v50 = vpop.eup %1459  ;;  %v1151_v54 = vmul.f32 0.5, %v1458_v11 }
 0x33d   :  { %v1150_v55 = vmul.f32 0.5, %v1460_v50  ;;  %v1161_v13 = vmul.f32 %v1153_v48, %v1104_v4  ;;  %v1170_v61 = vcombine.low %v1155_v10, %v1157_v43  ;;  %v1169_v0 = vrot.slane %v1162_v56, %v1715_v37 }
 0x33e   :  { %v1159_v62 = vmul.f32 %v1151_v54, %v1805_v52 }
 0x33f   :  { %v1158_v39 = vmul.f32 %v1150_v55, %v1815_v3  ;;  %v1177_v28 = vrot.slane %v1170_v61, %v1715_v37 }
 0x340   :  { %v1186_v1 = vcombine.low %v1159_v62, %v1161_v13 }
 0x341   :  { %v1195_v22 = vcombine.high %v1169_v0, %v1177_v28  ;;  %v1194_v4 = vcombine.low %v1169_v0, %v1177_v28 }
 0x342   :  { %v1462_v59 = vpop.eup %1461  ;;  %v1193_v36 = vrot.slane %v1186_v1, %v1715_v37 }
 0x343   :  { %v1152_v63 = vmul.f32 0.5, %v1462_v59  ;;  %v1209_v52 = vrot.slane %v1195_v22, %v1736_v60  ;;  %v1202_v2 = vrot.slane %v1194_v4, %v1736_v60 }
 0x345   :  { %v1160_v51 = vmul.f32 %v1152_v63, %v1103_v19  ;;  %v675_v19 = vpop.permute.xlu0 %674 }
 0x347   :  { %v1178_v35 = vcombine.low %v1158_v39, %v1160_v51 }
 0x349   :  { %v1185_v16 = vrot.slane %v1178_v35, %v1715_v37 }
 0x34b   :  { %v1211_v24 = vcombine.high %v1185_v16, %v1193_v36  ;;  %v1210_v5 = vcombine.low %v1185_v16, %v1193_v36 }
 0x34d   :  { %v1225_v17 = vrot.slane %v1211_v24, %v1736_v60  ;;  %v1218_v3 = vrot.slane %v1210_v5, %v1736_v60  ;;  %v686_v60 = vsel %vm685_vm4, %v669_v58, %v675_v19 }
 0x34f   :  { %v1228_v25 = vcombine.low %v1209_v52, %v1225_v17  ;;  %v1227_v15 = vcombine.high %v1202_v2, %v1218_v3  ;;  %v1226_v26 = vcombine.low %v1202_v2, %v1218_v3  ;;  %v1229_v37 = vcombine.high %v1209_v52, %v1225_v17 }
 0x351   :  { %1235 = vrot.lane.b32.xlu0 %v1228_v25, %s1544_s4  ;;  %1231 = vrot.lane.b32.xlu1 %v1227_v15, %s1545_s22 }
 0x355   :  { %1239 = vrot.lane.b32.xlu0 %v1229_v37, %s1546_s23  ;;  %682 = vrot.lane.b32.xlu1 %v672_v20, %s1547_s24  ;;  %v688_v20 = vsel %vm687_vm7, %v686_v60, %v679_v29 }
 0x3c3   :  { %v1236_v31 = vpop.permute.xlu0 %1235  ;;  %v1232_v32 = vpop.permute.xlu1 %1231 }
 0x3c4   :  { %v1242_v21 = vsel %vm51_vm0, %v1226_v26, %v1232_v32 }
 0x3c5   :  { %v1244_v9 = vsel %vm1243_vm6, %v1242_v21, %v1236_v31 }
 0x3c7   :  { %v1240_v6 = vpop.permute.xlu0 %1239  ;;  %v683_v23 = vpop.permute.xlu1 %682 }
 0x3c8   :  { %v1246_v33 = vsel %vm1245_vm8, %v1244_v9, %v1240_v6  ;;  %v690_v34 = vsel %vm689_vm9, %v688_v20, %v683_v23 }
 0x3c9   :  { %1247 = vst [vmem:[#allocation5] sm:$0xff] %v1246_v33  ;;  %691 = vst.msk [vmem:[#allocation6] sm:$0xff] %vm51_vm0, %v690_v34 }
 0x3ca   :  { %1496 = shalt.err (!%p1493_p12)
}
 0x3cb   :  { %s1497_s8 = scalar_lea.hbm %s1885_s5, 128 }
 0x3cc   :  { %p1498_p13 = scmp.ne.s32.totalorder %s1885_s5, %s1497_s8  ;;  %p1501_p0 = scmp.lt.u32.totalorder %s1497_s8, %s1885_s5 }
 0x3ce   :  { %p1503_p1 = pnand %p1501_p0, %p1498_p13 }
 0x3d0   :  { %1506 = shalt.err (!%p1503_p1)
}
 0x3d1   :  { %1257 = dma.vmem_to_hbm [thread:$0]  %s1255_s26, 128, %s1885_s5, [#allocation4]  }
 0x3d2   :  { %s1507_s15 = scalar_lea.vmem %s1265_s28, 128  ;;  %p1512_p3 = scmp.lt.s32.totalorder %s1265_s28, %s1265_s28 }
 0x3d3   :  { %p1508_p2 = scmp.ne.s32.totalorder %s1265_s28, %s1507_s15  ;;  %p1513_p4 = scmp.lt.s32.totalorder %s1507_s15, %s1507_s15 }
 0x3d5   :  { %p1514_p5 = por %p1513_p4, %p1512_p3 }
 0x3d7   :  { %p1515_p6 = pnand %p1514_p5, %p1508_p2 }
 0x3d9   :  { %1518 = shalt.err (!%p1515_p6)
}
 0x3da   :  { %s1519_s18 = scalar_lea.hbm %s1886_s6, 128 }
 0x3db   :  { %p1520_p7 = scmp.ne.s32.totalorder %s1886_s6, %s1519_s18  ;;  %p1523_p8 = scmp.lt.u32.totalorder %s1519_s18, %s1886_s6 }
 0x3dd   :  { %p1525_p9 = pnand %p1523_p8, %p1520_p7 }
 0x3df   :  { %1528 = shalt.err (!%p1525_p9)
}
 0x3e0   :  { %1267 = dma.vmem_to_hbm [thread:$0]  %s1265_s28, 128, %s1886_s6, [#allocation7]  }
 0x3e1   :  { %1531 = dma.done.wait [#allocation4], 128  }
 0x3e2   :  { %1532 = vsyncadd [#allocation4], 4294967168 }
 0x3e3   :  { %1533 = dma.done.wait [#allocation7], 128  }
 0x3e4   :  { %1534 = vsyncadd [#allocation7], 4294967168 }
 0x3e5   :  { %1274 = vsyncpa [#allocation3], 1 }
 0x3e6   :  { %1275 = vsyncpa [#allocation4], 1 }
 0x3e7   :  { %1276 = vsyncpa [#allocation7], 1 }

</bundles_post_ra>
